<compile_context>
chip_gen: v7x
topology: tpu7x:2x2x1
jax: 0.10.0
libtpu: 0.0.40
codegen_flags: <defaults>
</compile_context>

<pallas_src>
import functools
from typing import NamedTuple

import jax
import jax.numpy as jnp
from jax.experimental import pallas as pl
from jax.experimental.pallas import tpu as pltpu


# ----------------------------------------------------------------------------
# helpers
# ----------------------------------------------------------------------------
def _round_up(x: int, m: int) -> int:
    return ((x + m - 1) // m) * m


def _cdiv(a: int, b: int) -> int:
    return -(-a // b)


def _vmem_limit_bytes() -> int:
    """Per-generation scoped-VMEM budget (limit only, not an allocation)."""
    try:
        cap = int(pltpu.get_tpu_info().vmem_capacity_bytes)
    except Exception:
        cap = 64 * 1024 * 1024
    return min((cap * 7) // 10, 80 * 1024 * 1024)


def _best_tile(n: int, cap: int, step_cols: int = 384) -> int:
    """Tile (multiple of 256, <= cap) minimizing padded traffic + per-step overhead.

    score ~ num_tiles * (tile + step_cols), where step_cols models the ~0.35us
    fixed per-step cost in "equivalent columns of DMA".
    """
    hi = min(cap, _round_up(max(n, 1), 256))
    best_t, best_score = 256, None
    t = hi
    while t >= 256:
        score = _cdiv(n, t) * (t + step_cols)
        if best_score is None or score < best_score:
            best_score, best_t = score, t
        t -= 256
    return best_t


class _Plan(NamedTuple):
    tm: int
    tk: int
    rows_pad: int
    cols_pad: int
    resident: bool          # True -> support fully VMEM-resident


def _plan_tiles(n, h_pad, k_pad, mm_bytes, vmem_budget, force_stream=False) -> _Plan:
    tm0 = _best_tile(n, 1024)
    tk0 = _best_tile(n, 4096)

    def usage(tm, tk, resident):
        cols_pad = _cdiv(n, tk) * tk
        u = 2 * tm * tk * mm_bytes                       # adj tile, double-buffered
        u += 2 * tm * h_pad * 4 + 2 * tm * k_pad * 4     # z / q output blocks
        u += 2 * (h_pad + k_pad + h_pad * k_pad) * 4     # bias, mu_sq, mu^T
        u += 2 * (cols_pad if resident else tk) * h_pad * mm_bytes
        return u

    choices = [False] if force_stream else [True, False]
    tm, tk, resident = tm0, tk0, False
    for resident in choices:
        tm, tk = tm0, tk0
        while usage(tm, tk, resident) > vmem_budget and tk > 256:
            tk -= 256
        while usage(tm, tk, resident) > vmem_budget and tm > 256:
            tm -= 256
        if usage(tm, tk, resident) <= vmem_budget and (not resident or tk >= min(1024, tk0)):
            break
    return _Plan(tm, tk, _cdiv(n, tm) * tm, _cdiv(n, tk) * tk, resident)


# ----------------------------------------------------------------------------
# adjacency preparation (hoist cast + pad out of the per-forward path)
# ----------------------------------------------------------------------------
class PreparedAdj(NamedTuple):
    data: jax.Array          # (rows_pad, cols_pad), matmul dtype, zero padded
    n: int
    plan: _Plan


def prepare_adjacency(adj, nhid, n_clusters, matmul_dtype=jnp.bfloat16,
                      force_stream_support=False) -> PreparedAdj:
    """Cast + pad adj once; reuse across DEC iterations (adj is static in SpaGCN)."""
    adj = jnp.asarray(adj)
    n = adj.shape[0]
    h_pad = _round_up(nhid, 128)
    k_pad = _round_up(n_clusters, 128)
    mm_bytes = jnp.dtype(matmul_dtype).itemsize
    budget = int(_vmem_limit_bytes() * 0.85)
    plan = _plan_tiles(n, h_pad, k_pad, mm_bytes, budget, force_stream_support)
    adj_p = adj.astype(matmul_dtype)
    if plan.rows_pad != n or plan.cols_pad != n:
        adj_p = jnp.pad(adj_p, ((0, plan.rows_pad - n), (0, plan.cols_pad - n)))
    return PreparedAdj(adj_p, n, plan)


# ----------------------------------------------------------------------------
# kernels
# ----------------------------------------------------------------------------
def _support_kernel(x_ref, w_ref, out_ref):
    """support = x @ W (O(N*F*H), negligible next to the O(N^2) adj matmul)."""
    out_ref[...] = jnp.dot(
        x_ref[...], w_ref[...], preferred_element_type=jnp.float32
    ).astype(out_ref.dtype)


def _gc_dec_kernel(adj_ref, sup_ref, b_ref, mut_ref, musq_ref, z_ref, q_ref, *,
                   inv_alpha: float, alpha_p1: float, n_clusters: int,
                   tk: int, resident: bool):
    k = pl.program_id(1)

    @pl.when(k == 0)
    def _init():
        z_ref[...] = jnp.zeros_like(z_ref)           # f32 output block is the accumulator

    if resident:
        start = pl.multiple_of(k * tk, tk)
        sup = sup_ref[pl.ds(start, tk), :]            # slice of VMEM-resident support
    else:
        sup = sup_ref[...]                            # streamed (tk, h_pad) block

    # (TM, TK) @ (TK, H_pad) on the MXU, f32 accumulation (inputs may be bf16).
    z_ref[...] += jnp.dot(adj_ref[...], sup, preferred_element_type=jnp.float32)

    @pl.when(k == pl.num_programs(1) - 1)
    def _finalize():
        z = z_ref[...] + b_ref[...]                   # (TM, H_pad) f32
        z_ref[...] = z                                # lane-dense store

        # Student-t soft assignment:
        # ||z_n - mu_k||^2 = ||z_n||^2 + ||mu_k||^2 - 2 z_n.mu_k (MXU cross term)
        cross = jnp.dot(z, mut_ref[...], preferred_element_type=jnp.float32)  # (TM, K_pad)
        z_sq = jnp.sum(z * z, axis=1, keepdims=True)                          # (TM, 1)
        dist2 = jnp.maximum(z_sq + musq_ref[...] - 2.0 * cross, 0.0)

        q = 1.0 / (1.0 + dist2 * inv_alpha + 1e-8)
        q = q ** alpha_p1          # the /2.0 of the reference cancels in the row norm
        # mask padded cluster columns so they do not pollute the normalization
        col = jax.lax.broadcasted_iota(jnp.int32, q.shape, 1)
        q = jnp.where(col < n_clusters, q, 0.0)
        q = q / jnp.sum(q, axis=1, keepdims=True)     # exact: q feeds the DEC KL loss
        q_ref[...] = q.astype(q_ref.dtype)            # lane-dense store


# ----------------------------------------------------------------------------
# wrapper
# ----------------------------------------------------------------------------
def simple_gc_dec_forward(x, adj, weight, bias, mu, alpha=0.2,
                          matmul_dtype=jnp.bfloat16, force_stream_support=False):
    """Pallas forward. x:(N,F) adj:(N,N)|PreparedAdj weight:(F,H) bias:(H,) mu:(K,H)."""
    x = jnp.asarray(x, jnp.float32)
    weight = jnp.asarray(weight, jnp.float32)
    bias = jnp.asarray(bias, jnp.float32).reshape(1, -1)
    mu = jnp.asarray(mu, jnp.float32)

    N, F = x.shape
    H = weight.shape[1]
    K = mu.shape[0]

    if isinstance(adj, PreparedAdj):
        prepared = adj
        matmul_dtype = prepared.data.dtype
    else:
        prepared = prepare_adjacency(adj, H, K, matmul_dtype, force_stream_support)
    assert prepared.n == N, "prepared adjacency does not match x"

    tm, tk, rows_pad, cols_pad, resident = prepared.plan
    h_pad = _round_up(H, 128)
    k_pad = _round_up(K, 128)

    # Zero-pad to lane/sublane friendly shapes (sliced back at the end).
    x_p = jnp.pad(x, ((0, cols_pad - N), (0, 0))) if cols_pad != N else x
    w_p = jnp.pad(weight, ((0, 0), (0, h_pad - H))) if h_pad != H else weight
    b_p = jnp.pad(bias, ((0, 0), (0, h_pad - H))) if h_pad != H else bias
    mu_p = jnp.pad(mu, ((0, k_pad - K), (0, h_pad - H)))
    mut_p = mu_p.T                                              # (h_pad, k_pad)
    musq_p = jnp.sum(mu_p * mu_p, axis=1).reshape(1, k_pad)     # (1, k_pad)

    vmem_limit = _vmem_limit_bytes()

    # --- support = x @ W (computed once) ---
    ts = 256  # divides cols_pad (a multiple of 256)
    support = pl.pallas_call(
        _support_kernel,
        out_shape=jax.ShapeDtypeStruct((cols_pad, h_pad), matmul_dtype),
        grid=(cols_pad // ts,),
        in_specs=[
            pl.BlockSpec((ts, F), lambda i: (i, 0)),
            pl.BlockSpec((F, h_pad), lambda i: (0, 0)),
        ],
        out_specs=pl.BlockSpec((ts, h_pad), lambda i: (i, 0)),
        compiler_params=pltpu.CompilerParams(
            dimension_semantics=("parallel",),
            vmem_limit_bytes=vmem_limit),
    )(x_p, w_p)

    if resident:
        # Whole support kept VMEM-resident (constant block index -> fetched once).
        sup_spec = pl.BlockSpec((cols_pad, h_pad), lambda i, k: (0, 0))
    else:
        sup_spec = pl.BlockSpec((tk, h_pad), lambda i, k: (k, 0))

    kernel = functools.partial(
        _gc_dec_kernel,
        inv_alpha=1.0 / float(alpha),
        alpha_p1=float(alpha) + 1.0,
        n_clusters=K, tk=tk, resident=resident)

    # --- z = adj @ support + b ; q = student-t(z, mu) ---
    z_p, q_p = pl.pallas_call(
        kernel,
        out_shape=(
            jax.ShapeDtypeStruct((rows_pad, h_pad), jnp.float32),
            jax.ShapeDtypeStruct((rows_pad, k_pad), jnp.float32),
        ),
        grid_spec=pltpu.PrefetchScalarGridSpec(
            num_scalar_prefetch=0,
            grid=(rows_pad // tm, cols_pad // tk),          # reduction axis last
            in_specs=[
                pl.BlockSpec((tm, tk), lambda i, k: (i, k)),        # adj tile
                sup_spec,                                           # support
                pl.BlockSpec((1, h_pad), lambda i, k: (0, 0)),      # bias
                pl.BlockSpec((h_pad, k_pad), lambda i, k: (0, 0)),  # mu^T
                pl.BlockSpec((1, k_pad), lambda i, k: (0, 0)),      # ||mu||^2
            ],
            out_specs=(
                pl.BlockSpec((tm, h_pad), lambda i, k: (i, 0)),     # z (accumulator)
                pl.BlockSpec((tm, k_pad), lambda i, k: (i, 0)),     # q
            ),
        ),
        compiler_params=pltpu.CompilerParams(
            dimension_semantics=("parallel", "arbitrary"),
            vmem_limit_bytes=vmem_limit),
    )(prepared.data, support, b_p, mut_p, musq_p)

    return z_p[:N, :H], q_p[:N, :K]


# ----------------------------------------------------------------------------
# pure-JAX reference (mirrors the PyTorch forward exactly, full f32 precision)
# ----------------------------------------------------------------------------
def _reference_forward(x, adj, weight, bias, mu, alpha=0.2):
    hi = jax.lax.Precision.HIGHEST
    support = jnp.dot(x, weight, precision=hi)
    z = jnp.dot(adj, support, precision=hi) + bias
    dist2 = jnp.sum((z[:, None, :] - mu[None, :, :]) ** 2, axis=2)
    q = 1.0 / (1.0 + dist2 / alpha + 1e-8)
    q = q ** (alpha + 1.0) / 2.0
    q = q / jnp.sum(q, axis=1, keepdims=True)
    return z, q


# ----------------------------------------------------------------------------
# self-test
# ----------------------------------------------------------------------------
if __name__ == "__main__":
    # Small deterministic shapes: N nodes, nfeat input dim, nhid hidden, K clusters
    N, NFEAT, NHID, K = 64, 32, 16, 8
    ALPHA = 0.2

    key = jax.random.PRNGKey(0)
    k_x, k_adj, k_w, k_b, k_mu = jax.random.split(key, 5)

    x = jax.random.normal(k_x, (N, NFEAT), dtype=jnp.float32) * 0.1

    # Row-normalized non-negative adjacency (typical GCN preprocessing)
    adj_raw = jax.random.uniform(k_adj, (N, N), dtype=jnp.float32)
    adj = adj_raw / jnp.sum(adj_raw, axis=1, keepdims=True)

    # GraphConvolution params (uniform(-stdv, stdv), stdv = 1/sqrt(nhid))
    stdv = 1.0 / (NHID ** 0.5)
    weight = jax.random.uniform(k_w, (NFEAT, NHID), dtype=jnp.float32,
                                minval=-stdv, maxval=stdv)
    bias = jax.random.uniform(k_b, (NHID,), dtype=jnp.float32,
                              minval=-stdv, maxval=stdv)
    mu = jax.random.normal(k_mu, (K, NHID), dtype=jnp.float32) * 0.05

    z_ref, q_ref = _reference_forward(x, adj, weight, bias, mu, alpha=ALPHA)

    # --- f32 matmul path (tighter numerical check) ---
    z32, q32 = simple_gc_dec_forward(x, adj, weight, bias, mu, alpha=ALPHA,
                                     matmul_dtype=jnp.float32)
    jax.block_until_ready((z32, q32))
    assert jnp.allclose(z32, z_ref, atol=5e-4, rtol=5e-3), "z mismatch (f32 path)"
    assert jnp.allclose(q32, q_ref, atol=2e-3, rtol=2e-2), "q mismatch (f32 path)"
    assert jnp.allclose(jnp.sum(q32, axis=1), 1.0, atol=1e-4), "q rows must sum to ~1"

    # --- default bf16 adj/support path (bandwidth-optimized, resident support) ---
    z16, q16 = simple_gc_dec_forward(x, adj, weight, bias, mu, alpha=ALPHA)
    jax.block_until_ready((z16, q16))
    assert jnp.allclose(z16, z_ref, atol=5e-3, rtol=5e-2), "z mismatch (bf16 path)"
    assert jnp.allclose(q16, q_ref, atol=5e-3, rtol=5e-2), "q mismatch (bf16 path)"

    # --- streamed-support fallback path (large-N / low-VMEM configuration) ---
    zs, qs = simple_gc_dec_forward(x, adj, weight, bias, mu, alpha=ALPHA,
                                   force_stream_support=True)
    jax.block_until_ready((zs, qs))
    assert jnp.allclose(zs, z_ref, atol=5e-3, rtol=5e-2), "z mismatch (streamed path)"
    assert jnp.allclose(qs, q_ref, atol=5e-3, rtol=5e-2), "q mismatch (streamed path)"

    # --- prepared adjacency reuse (adj cast+pad hoisted out of forward) ---
    prep = prepare_adjacency(adj, NHID, K, matmul_dtype=jnp.bfloat16)
    for _ in range(2):
        zp, qp = simple_gc_dec_forward(x, prep, weight, bias, mu, alpha=ALPHA)
        jax.block_until_ready((zp, qp))
    assert jnp.allclose(zp, z_ref, atol=5e-3, rtol=5e-2), "z mismatch (prepared adj)"
    assert jnp.allclose(qp, q_ref, atol=5e-3, rtol=5e-2), "q mismatch (prepared adj)"

    # --- non-aligned shapes exercise the padding / cluster masking ---
    N2, F2, H2, K2 = 100, 20, 12, 7
    kk = jax.random.split(jax.random.PRNGKey(1), 5)
    x2 = jax.random.normal(kk[0], (N2, F2), dtype=jnp.float32) * 0.1
    adj2 = jax.random.uniform(kk[1], (N2, N2), dtype=jnp.float32)
    adj2 = adj2 / jnp.sum(adj2, axis=1, keepdims=True)
    sd2 = 1.0 / (H2 ** 0.5)
    w2 = jax.random.uniform(kk[2], (F2, H2), dtype=jnp.float32, minval=-sd2, maxval=sd2)
    b2 = jax.random.uniform(kk[3], (H2,), dtype=jnp.float32, minval=-sd2, maxval=sd2)
    mu2 = jax.random.normal(kk[4], (K2, H2), dtype=jnp.float32) * 0.05

    z2, q2 = simple_gc_dec_forward(x2, adj2, w2, b2, mu2, alpha=ALPHA)
    jax.block_until_ready((z2, q2))
    z2r, q2r = _reference_forward(x2, adj2, w2, b2, mu2, alpha=ALPHA)
    assert z2.shape == (N2, H2) and q2.shape == (N2, K2), "bad output shapes"
    assert jnp.allclose(z2, z2r, atol=5e-3, rtol=5e-2), "z mismatch (padded case)"
    assert jnp.allclose(q2, q2r, atol=5e-3, rtol=5e-2), "q mismatch (padded case)"

    # TODO(synk): fit()/loss_function()/target_distribution() are host-side
    # training / clustering (louvain, kmeans, optimizer loop) and are out of
    # scope for the forward-pass kernel.
    print("KERNEL_OK")
</pallas_src>

<mosaic_0001>
module attributes {stable_mosaic.version = 11 : i64} {
  func.func @_support_kernel(%arg0: i32, %arg1: memref<256x32xf32, #tpu.memory_space<vmem>>, %arg2: memref<32x128xf32, #tpu.memory_space<vmem>>, %arg3: memref<256x128xf32, #tpu.memory_space<vmem>>) attributes {dimension_semantics = [#tpu.dimension_semantics<parallel>], iteration_bounds = array<i64: 1>, scalar_prefetch = 0 : i64, scratch_operands = 0 : i64, tpu.core_type = #tpu.core_type<tc>, window_params = [{transform_indices = @transform_0, window_bounds = array<i64: 256, 32>}, {pipeline_mode = #tpu.pipeline_mode<synchronous>, transform_indices = @transform_1, window_bounds = array<i64: 32, 128>}, {transform_indices = @transform_2, window_bounds = array<i64: 256, 128>}]} {
    %c0 = arith.constant 0 : index
    %c0_0 = arith.constant 0 : index
    %0 = vector.load %arg1[%c0, %c0_0] : memref<256x32xf32, #tpu.memory_space<vmem>>, vector<256x32xf32>
    %c0_1 = arith.constant 0 : index
    %c0_2 = arith.constant 0 : index
    %1 = vector.load %arg2[%c0_1, %c0_2] : memref<32x128xf32, #tpu.memory_space<vmem>>, vector<32x128xf32>
    %cst = arith.constant dense<0.000000e+00> : vector<256x128xf32>
    %2 = tpu.matmul %0, %1, %cst {dimension_numbers = #tpu.dot_dimension_numbers<[1], [0], [0], [1], [0, 0, 1, 1], [], []>} : vector<256x32xf32>, vector<32x128xf32>, vector<256x128xf32> -> vector<256x128xf32>
    %c0_3 = arith.constant 0 : index
    %c0_4 = arith.constant 0 : index
    %3 = vector.load %arg3[%c0_3, %c0_4] : memref<256x128xf32, #tpu.memory_space<vmem>>, vector<256x128xf32>
    tpu.vector_store %arg3[%c0_3, %c0_4], %2 {strides = array<i32>} : memref<256x128xf32, #tpu.memory_space<vmem>>, vector<256x128xf32>,
    return
  }
  func.func @transform_0(%arg0: i32) -> (i32, i32) {
    %c0_i32 = arith.constant 0 : i32
    %c0_i32_0 = arith.constant 0 : i32
    return %arg0, %c0_i32 : i32, i32
  }
  func.func @transform_1(%arg0: i32) -> (i32, i32) {
    %c0_i32 = arith.constant 0 : i32
    %c0_i32_0 = arith.constant 0 : i32
    %c0_i32_1 = arith.constant 0 : i32
    return %c0_i32, %c0_i32_0 : i32, i32
  }
  func.func @transform_2(%arg0: i32) -> (i32, i32) {
    %c0_i32 = arith.constant 0 : i32
    %c0_i32_0 = arith.constant 0 : i32
    return %arg0, %c0_i32 : i32, i32
  }
}

</mosaic_0001>

<bundles_post_ra>
// kernel: tpu_custom_call.1
= control target key start
LH: loop header
LB: loop body
LE: loop exit
PB: predicated region body
PF: predicated region fallthrough
CT: control target
= control target key end

     0   :  { %vm48_vm0 = vcmask 261120   ;;  %s751_s0 = inlined_call_operand.vmem [shape: f32[256,32], index: 0, kind: input, shape index: {}]   ;;  %s752_s1 = inlined_call_operand.vmem [shape: f32[32,128], index: 1, kind: input, shape index: {}]   ;;  %s753_s2 = inlined_call_operand.hbm [shape: f32[256,128], index: 2, kind: output, shape index: {}]  }
   0x1   :  { %v44_v0 = vld [vmem:[%s752_s1] sm:$0xff]  ;;  %v45_v1 = vld [vmem:[%s752_s1 + $0x8] sm:$0xff]  ;;  %v46_v2 = vld [vmem:[%s752_s1 + $0x10] sm:$0xff] }
   0x2   :  { %v542_v3 = vpack.c.bf16 %v45_v1, %v44_v0  ;;  %v47_v4 = vld [vmem:[%s752_s1 + $0x18] sm:$0xff]  ;;  %v12_v5 = vld [vmem:[%s751_s0] sm:$0xff]  ;;  %v13_v8 = vld [vmem:[%s751_s0 + $0x8] sm:$0xff] }
   0x3   :  { %v28_v6 = vld [vmem:[%s751_s0 + $0x80] sm:$0xff]  ;;  %v546_v7 = vpack.c.bf16 %v47_v4, %v46_v2  ;;  %494 = vmatprep.mubr.msk.f32.mxu0 %vm48_vm0, %v12_v5  ;;  %v29_v9 = vld [vmem:[%s751_s0 + $0x88] sm:$0xff]  ;;  %v14_v10 = vld [vmem:[%s751_s0 + $0x10] sm:$0xff] }
   0x4   :  { %518 = vmatprep.mubr.msk.f32.mxu1 %vm48_vm0, %v28_v6  ;;  %543 = vmatprep.subr.bf16.mxu0 %v542_v3  ;;  %v30_v11 = vld [vmem:[%s751_s0 + $0x90] sm:$0xff]  ;;  %v15_v12 = vld [vmem:[%s751_s0 + $0x18] sm:$0xff] }
   0x5   :  { %550 = vmatprep.subr.bf16.mxu1 %v542_v3  ;;  %545 = vmatpush3.bf16.msra.mxu0 %v542_v3  ;;  %v31_v13 = vld [vmem:[%s751_s0 + $0x98] sm:$0xff] }
   0x6   :  { %552 = vmatpush3.bf16.msra.mxu1 %v542_v3  ;;  %547 = vmatprep.subr.bf16.mxu0 %v546_v7 }
   0x7   :  { %551 = vmatprep.subr.bf16.mxu1 %v546_v7 }
   0x9   :  { %549 = vmatpush3.bf16.msra.mxu0 %v546_v7 }
   0xa   :  { %553 = vmatpush3.bf16.msra.mxu1 %v546_v7 }
   0xc   :  { %495 = vmatmul.mubr.msk.f32.vlgmr.msra.gmra.mrb[0].mxu0 %vm48_vm0, %v13_v8 }
   0xd   :  { %519 = vmatmul.mubr.msk.f32.vlgmr.msra.gmra.mrb[0].mxu1 %vm48_vm0, %v29_v9  ;;  %497 = vmatprep.mubr.msk.f32.mxu0 %vm48_vm0, %v14_v10 }
   0xe   :  { %521 = vmatprep.mubr.msk.f32.mxu1 %vm48_vm0, %v30_v11 }
   0xf   :  { %7 = vsyncpa [#allocation3], 0  ;;  %v16_v14 = vld [vmem:[%s751_s0 + $0x20] sm:$0xff]  ;;  %v17_v16 = vld [vmem:[%s751_s0 + $0x28] sm:$0xff] }
  0x10   :  { %v32_v15 = vld [vmem:[%s751_s0 + $0xa0] sm:$0xff]  ;;  %498 = vmatmul.mubr.msk.f32.gmra.mrb[2].mxu0 %vm48_vm0, %v15_v12  ;;  %v33_v17 = vld [vmem:[%s751_s0 + $0xa8] sm:$0xff]  ;;  %v18_v18 = vld [vmem:[%s751_s0 + $0x30] sm:$0xff] }
  0x11   :  { %522 = vmatmul.mubr.msk.f32.gmra.mrb[2].mxu1 %vm48_vm0, %v31_v13  ;;  %500 = vmatprep.mubr.msk.f32.mxu0 %vm48_vm0, %v16_v14  ;;  %v34_v19 = vld [vmem:[%s751_s0 + $0xb0] sm:$0xff]  ;;  %v19_v20 = vld [vmem:[%s751_s0 + $0x38] sm:$0xff]  ;;  %v20_v22 = vld [vmem:[%s751_s0 + $0x40] sm:$0xff] }
  0x12   :  { %524 = vmatprep.mubr.msk.f32.mxu1 %vm48_vm0, %v32_v15  ;;  %v35_v21 = vld [vmem:[%s751_s0 + $0xb8] sm:$0xff]  ;;  %v36_v23 = vld [vmem:[%s751_s0 + $0xc0] sm:$0xff]  ;;  %v21_v24 = vld [vmem:[%s751_s0 + $0x48] sm:$0xff] }
  0x13   :  { %v37_v25 = vld [vmem:[%s751_s0 + $0xc8] sm:$0xff]  ;;  %v22_v26 = vld [vmem:[%s751_s0 + $0x50] sm:$0xff]  ;;  %v23_v28 = vld [vmem:[%s751_s0 + $0x58] sm:$0xff] }
  0x14   :  { %501 = vmatmul.mubr.msk.f32.gmra.mrb[4].mxu0 %vm48_vm0, %v17_v16  ;;  %v38_v27 = vld [vmem:[%s751_s0 + $0xd0] sm:$0xff]  ;;  %v39_v29 = vld [vmem:[%s751_s0 + $0xd8] sm:$0xff]  ;;  %v24_v30 = vld [vmem:[%s751_s0 + $0x60] sm:$0xff] }
  0x15   :  { %525 = vmatmul.mubr.msk.f32.gmra.mrb[4].mxu1 %vm48_vm0, %v33_v17  ;;  %503 = vmatprep.mubr.msk.f32.mxu0 %vm48_vm0, %v18_v18  ;;  %v40_v31 = vld [vmem:[%s751_s0 + $0xe0] sm:$0xff]  ;;  %v25_v32 = vld [vmem:[%s751_s0 + $0x68] sm:$0xff]  ;;  %v26_v34 = vld [vmem:[%s751_s0 + $0x70] sm:$0xff] }
  0x16   :  { %527 = vmatprep.mubr.msk.f32.mxu1 %vm48_vm0, %v34_v19  ;;  %v41_v33 = vld [vmem:[%s751_s0 + $0xe8] sm:$0xff]  ;;  %v42_v35 = vld [vmem:[%s751_s0 + $0xf0] sm:$0xff]  ;;  %v27_v36 = vld [vmem:[%s751_s0 + $0x78] sm:$0xff] }
  0x17   :  { %v43_v37 = vld [vmem:[%s751_s0 + $0xf8] sm:$0xff]  ;;  %s581_s0 = smov [#allocation2]  }
  0x18   :  { %504 = vmatmul.mubr.msk.f32.gmra.mrb[6].mxu0 %vm48_vm0, %v19_v20  ;;  %s407_s22 = sshll.u32 %s581_s0, 4  ;;  %s408_s22 = int_to_ptr.vmem [resolvable:$true] %s407_s22 }
  0x19   :  { %528 = vmatmul.mubr.msk.f32.gmra.mrb[6].mxu1 %vm48_vm0, %v35_v21  ;;  %506 = vmatprep.mubr.msk.f32.mxu0 %vm48_vm0, %v20_v22  ;;  %s557_s23 = scalar_lea.vmem %s408_s22, 4096  ;;  %p562_p1 = scmp.lt.s32.totalorder %s408_s22, %s408_s22 }
  0x1a   :  { %530 = vmatprep.mubr.msk.f32.mxu1 %vm48_vm0, %v36_v23  ;;  %p558_p0 = scmp.ne.s32.totalorder %s408_s22, %s557_s23  ;;  %p563_p2 = scmp.lt.s32.totalorder %s557_s23, %s557_s23 }
  0x1c   :  { %507 = vmatmul.mubr.msk.f32.gmra.mrb[8].mxu0 %vm48_vm0, %v21_v24  ;;  %p564_p3 = por %p563_p2, %p562_p1 }
  0x1d   :  { %531 = vmatmul.mubr.msk.f32.gmra.mrb[8].mxu1 %vm48_vm0, %v37_v25  ;;  %509 = vmatprep.mubr.msk.f32.mxu0 %vm48_vm0, %v22_v26 }
  0x1e   :  { %533 = vmatprep.mubr.msk.f32.mxu1 %vm48_vm0, %v38_v27  ;;  %p565_p4 = pnand %p564_p3, %p558_p0 }
  0x20   :  { %510 = vmatmul.mubr.msk.f32.gmra.mrb[10].mxu0 %vm48_vm0, %v23_v28 }
  0x21   :  { %534 = vmatmul.mubr.msk.f32.gmra.mrb[10].mxu1 %vm48_vm0, %v39_v29  ;;  %512 = vmatprep.mubr.msk.f32.mxu0 %vm48_vm0, %v24_v30 }
  0x22   :  { %536 = vmatprep.mubr.msk.f32.mxu1 %vm48_vm0, %v40_v31 }
  0x24   :  { %513 = vmatmul.mubr.msk.f32.gmra.mrb[12].mxu0 %vm48_vm0, %v25_v32 }
  0x25   :  { %537 = vmatmul.mubr.msk.f32.gmra.mrb[12].mxu1 %vm48_vm0, %v41_v33  ;;  %515 = vmatprep.mubr.msk.f32.mxu0 %vm48_vm0, %v26_v34 }
  0x26   :  { %539 = vmatprep.mubr.msk.f32.mxu1 %vm48_vm0, %v42_v35 }
  0x28   :  { %516 = vmatmul.mubr.msk.f32.gmra.mrb[14].mxu0 %vm48_vm0, %v27_v36 }
  0x29   :  { %540 = vmatmul.mubr.msk.f32.gmra.mrb[14].mxu1 %vm48_vm0, %v43_v37 }
  0xdf   :  { %v496_v38 = vpop.f32.mrb[0].mxu0 }
  0xe0   :  { %v520_v39 = vpop.f32.mrb[0].mxu1  ;;  %371 = vst [vmem:[#allocation2 + $0x8] sm:$0xff] %v496_v38  ;;  %v211_v40 = vpop.f32.mrb[1].mxu0 }
  0xe1   :  { %387 = vst [vmem:[#allocation2 + $0x88] sm:$0xff] %v520_v39  ;;  %v291_v41 = vpop.f32.mrb[1].mxu1  ;;  %370 = vst [vmem:[#allocation2] sm:$0xff] %v211_v40 }
  0xe2   :  { %386 = vst [vmem:[#allocation2 + $0x80] sm:$0xff] %v291_v41 }
  0xe3   :  { %v499_v42 = vpop.f32.mrb[2].mxu0 }
  0xe4   :  { %v523_v43 = vpop.f32.mrb[2].mxu1  ;;  %373 = vst [vmem:[#allocation2 + $0x18] sm:$0xff] %v499_v42  ;;  %v221_v44 = vpop.f32.mrb[3].mxu0 }
  0xe5   :  { %389 = vst [vmem:[#allocation2 + $0x98] sm:$0xff] %v523_v43  ;;  %v301_v45 = vpop.f32.mrb[3].mxu1  ;;  %372 = vst [vmem:[#allocation2 + $0x10] sm:$0xff] %v221_v44 }
  0xe6   :  { %388 = vst [vmem:[#allocation2 + $0x90] sm:$0xff] %v301_v45 }
  0xe7   :  { %v502_v46 = vpop.f32.mrb[4].mxu0 }
  0xe8   :  { %v526_v47 = vpop.f32.mrb[4].mxu1  ;;  %375 = vst [vmem:[#allocation2 + $0x28] sm:$0xff] %v502_v46  ;;  %v231_v48 = vpop.f32.mrb[5].mxu0 }
  0xe9   :  { %391 = vst [vmem:[#allocation2 + $0xa8] sm:$0xff] %v526_v47  ;;  %v311_v49 = vpop.f32.mrb[5].mxu1  ;;  %374 = vst [vmem:[#allocation2 + $0x20] sm:$0xff] %v231_v48 }
  0xea   :  { %390 = vst [vmem:[#allocation2 + $0xa0] sm:$0xff] %v311_v49 }
  0xeb   :  { %v505_v50 = vpop.f32.mrb[6].mxu0 }
  0xec   :  { %v529_v51 = vpop.f32.mrb[6].mxu1  ;;  %377 = vst [vmem:[#allocation2 + $0x38] sm:$0xff] %v505_v50  ;;  %v241_v52 = vpop.f32.mrb[7].mxu0 }
  0xed   :  { %393 = vst [vmem:[#allocation2 + $0xb8] sm:$0xff] %v529_v51  ;;  %v321_v53 = vpop.f32.mrb[7].mxu1  ;;  %376 = vst [vmem:[#allocation2 + $0x30] sm:$0xff] %v241_v52 }
  0xee   :  { %392 = vst [vmem:[#allocation2 + $0xb0] sm:$0xff] %v321_v53 }
  0xef   :  { %v508_v54 = vpop.f32.mrb[8].mxu0 }
  0xf0   :  { %v532_v55 = vpop.f32.mrb[8].mxu1  ;;  %379 = vst [vmem:[#allocation2 + $0x48] sm:$0xff] %v508_v54  ;;  %v251_v56 = vpop.f32.mrb[9].mxu0 }
  0xf1   :  { %395 = vst [vmem:[#allocation2 + $0xc8] sm:$0xff] %v532_v55  ;;  %v331_v57 = vpop.f32.mrb[9].mxu1  ;;  %378 = vst [vmem:[#allocation2 + $0x40] sm:$0xff] %v251_v56 }
  0xf2   :  { %394 = vst [vmem:[#allocation2 + $0xc0] sm:$0xff] %v331_v57 }
  0xf3   :  { %v511_v58 = vpop.f32.mrb[10].mxu0 }
  0xf4   :  { %v535_v59 = vpop.f32.mrb[10].mxu1  ;;  %381 = vst [vmem:[#allocation2 + $0x58] sm:$0xff] %v511_v58  ;;  %v261_v60 = vpop.f32.mrb[11].mxu0 }
  0xf5   :  { %397 = vst [vmem:[#allocation2 + $0xd8] sm:$0xff] %v535_v59  ;;  %v341_v61 = vpop.f32.mrb[11].mxu1  ;;  %380 = vst [vmem:[#allocation2 + $0x50] sm:$0xff] %v261_v60 }
  0xf6   :  { %396 = vst [vmem:[#allocation2 + $0xd0] sm:$0xff] %v341_v61 }
  0xf7   :  { %v514_v62 = vpop.f32.mrb[12].mxu0 }
  0xf8   :  { %v538_v63 = vpop.f32.mrb[12].mxu1  ;;  %383 = vst [vmem:[#allocation2 + $0x68] sm:$0xff] %v514_v62  ;;  %v271_v0 = vpop.f32.mrb[13].mxu0 }
  0xf9   :  { %399 = vst [vmem:[#allocation2 + $0xe8] sm:$0xff] %v538_v63  ;;  %v351_v1 = vpop.f32.mrb[13].mxu1  ;;  %382 = vst [vmem:[#allocation2 + $0x60] sm:$0xff] %v271_v0 }
  0xfa   :  { %398 = vst [vmem:[#allocation2 + $0xe0] sm:$0xff] %v351_v1 }
  0xfb   :  { %v517_v2 = vpop.f32.mrb[14].mxu0 }
  0xfc   :  { %v541_v3 = vpop.f32.mrb[14].mxu1  ;;  %385 = vst [vmem:[#allocation2 + $0x78] sm:$0xff] %v517_v2  ;;  %v281_v4 = vpop.f32.mrb[15].mxu0 }
  0xfd   :  { %401 = vst [vmem:[#allocation2 + $0xf8] sm:$0xff] %v541_v3  ;;  %v361_v5 = vpop.f32.mrb[15].mxu1  ;;  %384 = vst [vmem:[#allocation2 + $0x70] sm:$0xff] %v281_v4 }
  0xfe   :  { %400 = vst [vmem:[#allocation2 + $0xf0] sm:$0xff] %v361_v5 }
  0xff   :  { %568 = shalt.err (!%p565_p4)
}
 0x100   :  { %s569_s26 = scalar_lea.hbm %s753_s2, 4096 }
 0x101   :  { %p570_p5 = scmp.ne.s32.totalorder %s753_s2, %s569_s26  ;;  %p573_p6 = scmp.lt.u32.totalorder %s569_s26, %s753_s2 }
 0x103   :  { %p575_p7 = pnand %p573_p6, %p570_p5 }
 0x105   :  { %578 = shalt.err (!%p575_p7)
}
 0x106   :  { %s582_s3 = smov 128   ;;  %s583_s4 = smov 8  }
 0x107   :  { %413 = dma.vmem_to_hbm [thread:$0]  %s408_s22, 4096, %s753_s2, [#allocation3], %s582_s3, %s582_s3, %s583_s4  }
 0x108   :  { %579 = dma.done.wait [#allocation3], 4096  }
 0x109   :  { %580 = vsyncadd [#allocation3], 4294963200 }
 0x10a   :  { %417 = vsyncpa [#allocation3], 1 }

</bundles_post_ra>
